<compile_context>
chip_gen: v7x
topology: tpu7x:2x2x1
jax: 0.10.0
libtpu: 0.0.40
codegen_flags: <defaults>
</compile_context>

<pallas_src>
import math
import functools

import jax
import jax.numpy as jnp
from jax import lax
from jax.experimental import pallas as pl
from jax.experimental.pallas import tpu as pltpu


MASK_VALUE = -0.7 * float(jnp.finfo(jnp.float32).max)
VMEM_LIMIT_BYTES = 48 * 1024 * 1024  # explicit scoped-VMEM headroom (<= v7x 64 MiB)


def _pick_tile(dim, target, align):
    """Largest divisor of `dim` that is <= target and `align`-aligned.

    Falls back to the full extent only when no aligned divisor exists
    (keeps the (8,128)/full-dim block rule satisfied).
    """
    target = min(target, dim)
    if target == dim:
        return dim
    start = (target // align) * align
    for t in range(start, 0, -align):
        if dim % t == 0:
            return t
    # TODO(synk): pad to a tile multiple instead of the full-extent fallback
    # so pipelining survives awkward prime-ish dims.
    return dim


# ----------------------------------------------------------------------------
# Tiled linear (x @ w.T for PyTorch nn.Linear weight layout)
# ----------------------------------------------------------------------------
def _linear_kernel(x_ref, w_ref, o_ref, acc_ref):
    @pl.when(pl.program_id(2) == 0)
    def _init():
        acc_ref[...] = jnp.zeros_like(acc_ref)

    # x: (tm, tk), w: (tn, tk). Contract the K dims directly -> no in-kernel
    # transpose of the weight tile. fp32 accumulation on the MXU.
    acc_ref[...] += lax.dot_general(
        x_ref[...], w_ref[...],
        dimension_numbers=(((1,), (1,)), ((), ())),
        preferred_element_type=jnp.float32,
    )

    @pl.when(pl.program_id(2) == pl.num_programs(2) - 1)
    def _finalize():
        o_ref[...] = acc_ref[...].astype(o_ref.dtype)


def linear_pallas(x2d, w, *, tm=512, tn=512, tk=512):
    """x2d: (M, K), w: (N, K) (nn.Linear layout) -> (M, N) = x2d @ w.T."""
    M, K = x2d.shape
    N, K2 = w.shape
    assert K == K2
    # TODO(synk): store weights pre-transposed to (K, N) once at load time for
    # a lane-dense RHS stream instead of the transposed-RHS MXU path.
    tm = _pick_tile(M, tm, 8)     # sublane-aligned
    tn = _pick_tile(N, tn, 128)   # lane-aligned (output lane dim)
    tk = _pick_tile(K, tk, 128)   # lane-aligned (contraction dim)
    grid = (M // tm, N // tn, K // tk)

    return pl.pallas_call(
        _linear_kernel,
        out_shape=jax.ShapeDtypeStruct((M, N), x2d.dtype),
        grid_spec=pltpu.PrefetchScalarGridSpec(
            num_scalar_prefetch=0,
            grid=grid,
            in_specs=[
                pl.BlockSpec((tm, tk), lambda i, j, k: (i, k)),
                pl.BlockSpec((tn, tk), lambda i, j, k: (j, k)),
            ],
            out_specs=pl.BlockSpec((tm, tn), lambda i, j, k: (i, j)),
            scratch_shapes=[pltpu.VMEM((tm, tn), jnp.float32)],
        ),
        compiler_params=pltpu.CompilerParams(
            dimension_semantics=("parallel", "parallel", "arbitrary"),
            vmem_limit_bytes=VMEM_LIMIT_BYTES,
        ),
    )(x2d, w)


# ----------------------------------------------------------------------------
# Flash-style causal attention with GQA head packing
# ----------------------------------------------------------------------------
def _flash_attn_kernel(q_ref, k_ref, v_ref, o_ref, m_sc, l_sc, acc_sc, *,
                       sm_scale, block_q, block_kv, n_rep, causal):
    head_dim = q_ref.shape[-1]
    nq = n_rep * block_q

    q_idx = pl.program_id(2)
    kv_idx = pl.program_id(3)
    q_start = q_idx * block_q
    kv_start = kv_idx * block_kv

    @pl.when(kv_idx == 0)
    def _init():
        m_sc[...] = jnp.full_like(m_sc, -jnp.inf)
        l_sc[...] = jnp.zeros_like(l_sc)
        acc_sc[...] = jnp.zeros_like(acc_sc)

    def compute(apply_mask):
        # (n_rep, TQ, D) -> (n_rep*TQ, D): merges leading dims above the
        # (sublane, lane) tile, i.e. a free reshape.
        q = q_ref[0].reshape(nq, head_dim)
        if sm_scale != 1.0:
            q = q * jnp.asarray(sm_scale, q.dtype)
        k = k_ref[0, 0]                                        # (TKV, D)
        v = v_ref[0, 0]                                        # (TKV, D)

        # scores = q @ k.T (contract D directly, fp32 accumulate on the MXU).
        s = lax.dot_general(
            q, k,
            dimension_numbers=(((1,), (1,)), ((), ())),
            preferred_element_type=jnp.float32,
        )                                                      # (nq, TKV) fp32

        if apply_mask:
            # Row r of the packed Q block maps to sequence position
            # q_start + (r mod block_q).
            r = lax.broadcasted_iota(jnp.int32, (nq, block_kv), 0)
            if (block_q & (block_q - 1)) == 0:
                r_local = jnp.bitwise_and(r, block_q - 1)
            else:
                r_local = lax.rem(r, block_q)
            row = q_start + r_local
            col = kv_start + lax.broadcasted_iota(jnp.int32, (nq, block_kv), 1)
            s = jnp.where(row >= col, s, MASK_VALUE)

        m_prev = m_sc[...]                                     # (nq, 1)
        m_new = jnp.maximum(m_prev, jnp.max(s, axis=-1, keepdims=True))
        alpha = jnp.exp(m_prev - m_new)
        p = jnp.exp(s - m_new)                                 # (nq, TKV) fp32

        l_sc[...] = alpha * l_sc[...] + jnp.sum(p, axis=-1, keepdims=True)
        acc_sc[...] = alpha * acc_sc[...] + jnp.dot(
            p.astype(v.dtype), v, preferred_element_type=jnp.float32)
        m_sc[...] = m_new

    if causal:
        visited = kv_start <= q_start + (block_q - 1)          # tile intersects causal region
        unmasked = kv_start + (block_kv - 1) <= q_start        # tile fully below diagonal

        @pl.when(jnp.logical_and(visited, unmasked))
        def _interior():
            compute(False)   # no iota/compare/select on interior tiles

        @pl.when(jnp.logical_and(visited, jnp.logical_not(unmasked)))
        def _diagonal():
            compute(True)
    else:
        compute(False)

    @pl.when(kv_idx == pl.num_programs(3) - 1)
    def _finalize():
        inv_l = pl.reciprocal(l_sc[...], approx=False)  # once per q tile
        out = (acc_sc[...] * inv_l).astype(o_ref.dtype)
        o_ref[0] = out.reshape(n_rep, block_q, head_dim)


def flash_attention_pallas(q, k, v, *, sm_scale=1.0, causal=True,
                           block_q=256, block_kv=256):
    """q: (B, H, S, D); k, v: (B, H_kv, S, D) with H % H_kv == 0."""
    B, H, S, D = q.shape
    Bk, H_kv, S_k, D_k = k.shape
    assert B == Bk and S == S_k and D == D_k and H % H_kv == 0
    n_rep = H // H_kv

    # Cap the packed-Q rows (n_rep * block_q) to keep the (nq, TKV) fp32 score
    # tile at a sane vreg/VMEM footprint.
    max_q_rows = 512
    if n_rep * block_q > max_q_rows:
        block_q = max(max_q_rows // n_rep, 8)
    block_q = _pick_tile(S, block_q, 8)
    block_kv = _pick_tile(S, block_kv, 8)

    grid = (B, H_kv, S // block_q, S // block_kv)
    nq = n_rep * block_q

    if causal:
        def kv_index_map(b, g, qi, ki):
            # Clamp to the last KV block that intersects the causal region for
            # this Q block: masked iterations alias the previous block, so
            # Pallas elides the re-DMA (~2x less KV HBM traffic).
            last_valid = (qi * block_q + (block_q - 1)) // block_kv
            return (b, g, jnp.minimum(ki, last_valid), 0)
    else:
        def kv_index_map(b, g, qi, ki):
            return (b, g, ki, 0)

    kernel = functools.partial(
        _flash_attn_kernel, sm_scale=sm_scale,
        block_q=block_q, block_kv=block_kv, n_rep=n_rep, causal=causal)

    return pl.pallas_call(
        kernel,
        out_shape=jax.ShapeDtypeStruct((B, H, S, D), q.dtype),
        grid_spec=pltpu.PrefetchScalarGridSpec(
            num_scalar_prefetch=0,
            grid=grid,
            in_specs=[
                # Pack the n_rep query heads sharing KV head g into one block.
                pl.BlockSpec((1, n_rep, block_q, D),
                             lambda b, g, qi, ki: (b, g, qi, 0)),
                pl.BlockSpec((1, 1, block_kv, D), kv_index_map),
                pl.BlockSpec((1, 1, block_kv, D), kv_index_map),
            ],
            out_specs=pl.BlockSpec((1, n_rep, block_q, D),
                                   lambda b, g, qi, ki: (b, g, qi, 0)),
            scratch_shapes=[
                pltpu.VMEM((nq, 1), jnp.float32),   # m (running max)
                pltpu.VMEM((nq, 1), jnp.float32),   # l (running sum)
                pltpu.VMEM((nq, D), jnp.float32),   # acc
            ],
        ),
        compiler_params=pltpu.CompilerParams(
            dimension_semantics=("parallel", "parallel", "parallel", "arbitrary"),
            vmem_limit_bytes=VMEM_LIMIT_BYTES,
        ),
    )(q, k, v)


# ----------------------------------------------------------------------------
# Glue (RoPE, parameter setup) in plain JAX
# ----------------------------------------------------------------------------
def precompute_freqs_cis(head_dim, seqlen, theta=10000.0):
    freqs = 1.0 / (theta ** (jnp.arange(0, head_dim, 2, dtype=jnp.float32) / head_dim))
    t = jnp.arange(seqlen, dtype=jnp.float32)
    angles = jnp.outer(t, freqs)                  # (S, D//2)
    return jnp.cos(angles), jnp.sin(angles)


def apply_rotary_emb(xq, xk, freqs_cos, freqs_sin):
    # xq/xk: (B, S, H, D), interleaved (real, imag) pairs along last dim.
    def rot(x):
        xr = x[..., 0::2]
        xi = x[..., 1::2]
        fc = freqs_cos[None, :, None, :]
        fs = freqs_sin[None, :, None, :]
        out_r = xr * fc - xi * fs
        out_i = xr * fs + xi * fc
        return jnp.stack([out_r, out_i], axis=-1).reshape(x.shape)

    return rot(xq).astype(xq.dtype), rot(xk).astype(xk.dtype)


def attention_forward(params, x, start_pos, freqs_cos, freqs_sin, cfg):
    del start_pos  # prefill-only (see TODO at top)
    bsz, seqlen, dim = x.shape
    n_heads = cfg["n_heads"]
    n_kv_heads = cfg["n_kv_heads"]
    head_dim = cfg["head_dim"]

    # Fold 1/sqrt(head_dim) into wq (RoPE is a rotation, so the scale commutes
    # with it). In a real model this is done once at weight-load time.
    sm_scale = 1.0 / math.sqrt(head_dim)
    wq = params["wq"] * jnp.asarray(sm_scale, params["wq"].dtype)

    x2d = x.reshape(bsz * seqlen, dim)
    xq = linear_pallas(x2d, wq).reshape(bsz, seqlen, n_heads, head_dim)
    xk = linear_pallas(x2d, params["wk"]).reshape(bsz, seqlen, n_kv_heads, head_dim)
    xv = linear_pallas(x2d, params["wv"]).reshape(bsz, seqlen, n_kv_heads, head_dim)

    xq, xk = apply_rotary_emb(xq, xk, freqs_cos, freqs_sin)

    # (B, S, H, D) -> (B, H, S, D). No repeat_kv: GQA is handled inside the
    # attention kernel via the packed-Q BlockSpec + shared-KV index_map.
    xq_t = jnp.transpose(xq, (0, 2, 1, 3))
    xk_t = jnp.transpose(xk, (0, 2, 1, 3))
    xv_t = jnp.transpose(xv, (0, 2, 1, 3))

    out = flash_attention_pallas(xq_t, xk_t, xv_t, sm_scale=1.0, causal=True)

    out = jnp.transpose(out, (0, 2, 1, 3)).reshape(bsz * seqlen, n_heads * head_dim)
    out = linear_pallas(out, params["wo"]).reshape(bsz, seqlen, dim)
    return out


# ----------------------------------------------------------------------------
# Pure-JAX references
# ----------------------------------------------------------------------------
def repeat_kv_ref(x, n_rep):
    if n_rep == 1:
        return x
    b, s, nkv, d = x.shape
    return jnp.broadcast_to(x[:, :, :, None, :], (b, s, nkv, n_rep, d)).reshape(
        b, s, nkv * n_rep, d
    )


def attention_reference(params, x, start_pos, freqs_cos, freqs_sin, mask, cfg):
    bsz, seqlen, dim = x.shape
    n_heads, n_kv_heads, head_dim = cfg["n_heads"], cfg["n_kv_heads"], cfg["head_dim"]
    n_rep = n_heads // n_kv_heads

    xq = (x @ params["wq"].T).reshape(bsz, seqlen, n_heads, head_dim)
    xk = (x @ params["wk"].T).reshape(bsz, seqlen, n_kv_heads, head_dim)
    xv = (x @ params["wv"].T).reshape(bsz, seqlen, n_kv_heads, head_dim)
    xq, xk = apply_rotary_emb(xq, xk, freqs_cos, freqs_sin)
    keys = jnp.transpose(repeat_kv_ref(xk, n_rep), (0, 2, 1, 3))
    values = jnp.transpose(repeat_kv_ref(xv, n_rep), (0, 2, 1, 3))
    xq = jnp.transpose(xq, (0, 2, 1, 3))
    scores = jnp.einsum("bhqd,bhkd->bhqk", xq, keys) / math.sqrt(head_dim)
    scores = scores + mask[None, None]
    scores = jax.nn.softmax(scores.astype(jnp.float32), axis=-1).astype(xq.dtype)
    out = jnp.einsum("bhqk,bhkd->bhqd", scores, values)
    out = jnp.transpose(out, (0, 2, 1, 3)).reshape(bsz, seqlen, -1)
    return out @ params["wo"].T


def mha_reference(q, k, v, sm_scale, causal):
    """q: (B,H,S,D); k,v: (B,H_kv,S,D). Direct softmax reference for GQA."""
    n_rep = q.shape[1] // k.shape[1]
    k = jnp.repeat(k, n_rep, axis=1)
    v = jnp.repeat(v, n_rep, axis=1)
    s = jnp.einsum("bhqd,bhkd->bhqk", q, k) * sm_scale
    if causal:
        S = q.shape[2]
        cmask = jnp.arange(S)[:, None] >= jnp.arange(S)[None, :]
        s = jnp.where(cmask[None, None], s, float("-inf"))
    p = jax.nn.softmax(s.astype(jnp.float32), axis=-1).astype(q.dtype)
    return jnp.einsum("bhqk,bhkd->bhqd", p, v)


# ----------------------------------------------------------------------------
if __name__ == "__main__":
    # --- Test 1: full Attention forward (dim=32, n_heads=4, n_kv_heads=2) ---
    bsz, seqlen, dim = 2, 8, 32
    n_heads, n_kv_heads = 4, 2
    head_dim = dim // n_heads
    cfg = {"n_heads": n_heads, "n_kv_heads": n_kv_heads, "head_dim": head_dim}

    key = jax.random.PRNGKey(0)
    kx, kq, kk, kv, ko, kq2, kk2, kv2 = jax.random.split(key, 8)

    x = jax.random.normal(kx, (bsz, seqlen, dim), dtype=jnp.float32)
    params = {
        "wq": jax.random.normal(kq, (n_heads * head_dim, dim), jnp.float32) * 0.05,
        "wk": jax.random.normal(kk, (n_kv_heads * head_dim, dim), jnp.float32) * 0.05,
        "wv": jax.random.normal(kv, (n_kv_heads * head_dim, dim), jnp.float32) * 0.05,
        "wo": jax.random.normal(ko, (dim, n_heads * head_dim), jnp.float32) * 0.05,
    }

    start_pos = 0
    freqs_cos, freqs_sin = precompute_freqs_cis(head_dim, seqlen)

    out = attention_forward(params, x, start_pos, freqs_cos, freqs_sin, cfg)
    out = jax.block_until_ready(out)

    mask = jnp.where(
        jnp.arange(seqlen)[:, None] >= jnp.arange(seqlen)[None, :],
        0.0,
        float("-inf"),
    ).astype(jnp.float32)
    ref = attention_reference(params, x, start_pos, freqs_cos, freqs_sin, mask, cfg)

    assert out.shape == (bsz, seqlen, dim)
    assert jnp.allclose(out, ref, atol=1e-4, rtol=1e-4), "mismatch vs reference"

    # --- Test 2: flash kernel multi-tile path (exercises causal DMA clamp,
    #     diagonal/interior branches and GQA head packing across a 4x4 grid) ---
    B2, H2, Hkv2, S2, D2 = 1, 4, 2, 32, 8
    q2 = jax.random.normal(kq2, (B2, H2, S2, D2), jnp.float32)
    k2 = jax.random.normal(kk2, (B2, Hkv2, S2, D2), jnp.float32)
    v2 = jax.random.normal(kv2, (B2, Hkv2, S2, D2), jnp.float32)
    scale2 = 1.0 / math.sqrt(D2)
    out2 = flash_attention_pallas(q2, k2, v2, sm_scale=scale2, causal=True,
                                  block_q=8, block_kv=8)
    out2 = jax.block_until_ready(out2)
    ref2 = mha_reference(q2, k2, v2, scale2, causal=True)
    assert jnp.allclose(out2, ref2, atol=1e-4, rtol=1e-4), "flash mismatch vs reference"

    print("KERNEL_OK")
</pallas_src>

<mosaic_0001>
module attributes {stable_mosaic.version = 11 : i64} {
  func.func @_linear_kernel(%arg0: i32, %arg1: i32, %arg2: i32, %arg3: memref<16x32xf32, #tpu.memory_space<vmem>>, %arg4: memref<32x32xf32, #tpu.memory_space<vmem>>, %arg5: memref<16x32xf32, #tpu.memory_space<vmem>>, %arg6: memref<16x32xf32, #tpu.memory_space<vmem>>) attributes {dimension_semantics = [#tpu.dimension_semantics<parallel>, #tpu.dimension_semantics<parallel>, #tpu.dimension_semantics<arbitrary>], iteration_bounds = array<i64: 1, 1, 1>, scalar_prefetch = 0 : i64, scratch_operands = 1 : i64, tpu.core_type = #tpu.core_type<tc>, window_params = [{transform_indices = @transform_0, window_bounds = array<i64: 16, 32>}, {transform_indices = @transform_1, window_bounds = array<i64: 32, 32>}, {transform_indices = @transform_2, window_bounds = array<i64: 16, 32>}]} {
    %c0_i32 = arith.constant 0 : i32
    %0 = arith.cmpi eq, %arg2, %c0_i32 : i32
    %1 = arith.extui %0 : i1 to i32
    %c0_i32_0 = arith.constant 0 : i32
    %2 = arith.cmpi ne, %1, %c0_i32_0 : i32
    scf.if %2 {
      %cst_10 = arith.constant 0.000000e+00 : f32
      %12 = vector.broadcast %cst_10 : f32 to vector<16x32xf32>
      %c0_11 = arith.constant 0 : index
      %c0_12 = arith.constant 0 : index
      %13 = vector.load %arg6[%c0_11, %c0_12] : memref<16x32xf32, #tpu.memory_space<vmem>>, vector<16x32xf32>
      tpu.vector_store %arg6[%c0_11, %c0_12], %12 {strides = array<i32>} : memref<16x32xf32, #tpu.memory_space<vmem>>, vector<16x32xf32>,
    } else {
    }
    %c0 = arith.constant 0 : index
    %c0_1 = arith.constant 0 : index
    %3 = vector.load %arg6[%c0, %c0_1] : memref<16x32xf32, #tpu.memory_space<vmem>>, vector<16x32xf32>
    %c0_2 = arith.constant 0 : index
    %c0_3 = arith.constant 0 : index
    %4 = vector.load %arg3[%c0_2, %c0_3] : memref<16x32xf32, #tpu.memory_space<vmem>>, vector<16x32xf32>
    %c0_4 = arith.constant 0 : index
    %c0_5 = arith.constant 0 : index
    %5 = vector.load %arg4[%c0_4, %c0_5] : memref<32x32xf32, #tpu.memory_space<vmem>>, vector<32x32xf32>
    %cst = arith.constant dense<0.000000e+00> : vector<16x32xf32>
    %6 = tpu.matmul %4, %5, %cst {dimension_numbers = #tpu.dot_dimension_numbers<[1], [1], [0], [0], [0, 0, 1, 0], [], []>} : vector<16x32xf32>, vector<32x32xf32>, vector<16x32xf32> -> vector<16x32xf32>
    %7 = arith.addf %3, %6 : vector<16x32xf32>
    %c0_6 = arith.constant 0 : index
    %c0_7 = arith.constant 0 : index
    %8 = vector.load %arg6[%c0_6, %c0_7] : memref<16x32xf32, #tpu.memory_space<vmem>>, vector<16x32xf32>
    tpu.vector_store %arg6[%c0_6, %c0_7], %7 {strides = array<i32>} : memref<16x32xf32, #tpu.memory_space<vmem>>, vector<16x32xf32>,
    %c0_i32_8 = arith.constant 0 : i32
    %9 = arith.cmpi eq, %arg2, %c0_i32_8 : i32
    %10 = arith.extui %9 : i1 to i32
    %c0_i32_9 = arith.constant 0 : i32
    %11 = arith.cmpi ne, %10, %c0_i32_9 : i32
    scf.if %11 {
      %c0_10 = arith.constant 0 : index
      %c0_11 = arith.constant 0 : index
      %12 = vector.load %arg6[%c0_10, %c0_11] : memref<16x32xf32, #tpu.memory_space<vmem>>, vector<16x32xf32>
      %c0_12 = arith.constant 0 : index
      %c0_13 = arith.constant 0 : index
      %13 = vector.load %arg5[%c0_12, %c0_13] : memref<16x32xf32, #tpu.memory_space<vmem>>, vector<16x32xf32>
      tpu.vector_store %arg5[%c0_12, %c0_13], %12 {strides = array<i32>} : memref<16x32xf32, #tpu.memory_space<vmem>>, vector<16x32xf32>,
    } else {
    }
    return
  }
  func.func @transform_0(%arg0: i32, %arg1: i32, %arg2: i32) -> (i32, i32) {
    %c0_i32 = arith.constant 0 : i32
    return %arg0, %arg2 : i32, i32
  }
  func.func @transform_1(%arg0: i32, %arg1: i32, %arg2: i32) -> (i32, i32) {
    %c0_i32 = arith.constant 0 : i32
    return %arg1, %arg2 : i32, i32
  }
  func.func @transform_2(%arg0: i32, %arg1: i32, %arg2: i32) -> (i32, i32) {
    %c0_i32 = arith.constant 0 : i32
    return %arg0, %arg1 : i32, i32
  }
}

</mosaic_0001>

<bundles_post_ra>
// kernel: tpu_custom_call.1
= control target key start
LH: loop header
LB: loop body
LE: loop exit
PB: predicated region body
PF: predicated region fallthrough
CT: control target
= control target key end

     0   :  { %7 = vsyncpa [#allocation4], 0  ;;  %s367_s0 = inlined_call_operand.hbm [shape: f32[16,32], index: 0, kind: input, shape index: {}]   ;;  %s368_s1 = inlined_call_operand.hbm [shape: f32[32,32], index: 1, kind: input, shape index: {}]   ;;  %s369_s2 = inlined_call_operand.hbm [shape: f32[16,32], index: 2, kind: output, shape index: {}]  }
   0x1   :  { %8 = vsyncpa [#allocation7], 0 }
   0x2   :  { %9 = vsyncpa [#allocation5], 0  ;;  %s291_s9 = smov [#allocation3]   ;;  %s219_s13 = scalar_lea.hbm %s367_s0, 256 }
   0x3   :  { %s15_s10 = sshll.u32 %s291_s9, 4  ;;  %p220_p0 = scmp.ne.s32.totalorder %s367_s0, %s219_s13  ;;  %s16_s10 = int_to_ptr.vmem [resolvable:$true] %s15_s10 }
   0x4   :  { %p223_p1 = scmp.lt.u32.totalorder %s219_s13, %s367_s0 }
   0x6   :  { %p225_p2 = pnand %p223_p1, %p220_p0 }
   0x8   :  { %228 = shalt.err (!%p225_p2)
}
   0x9   :  { %s229_s18 = scalar_lea.vmem %s16_s10, 256  ;;  %p234_p4 = scmp.lt.s32.totalorder %s16_s10, %s16_s10 }
   0xa   :  { %p230_p3 = scmp.ne.s32.totalorder %s16_s10, %s229_s18  ;;  %p235_p5 = scmp.lt.s32.totalorder %s229_s18, %s229_s18 }
   0xc   :  { %p236_p6 = por %p235_p5, %p234_p4 }
   0xe   :  { %p237_p7 = pnand %p236_p6, %p230_p3 }
  0x10   :  { %240 = shalt.err (!%p237_p7)
}
  0x11   :  { %s292_s19 = smov 128   ;;  %s293_s20 = smov 8  }
  0x12   :  { %21 = dma.hbm_to_vmem [thread:$0]  %s367_s0, 256, %s16_s10, [#allocation4], %s292_s19, %s292_s19, %s293_s20  }
  0x13   :  { %s294_s23 = smov [#allocation6]   ;;  %s241_s27 = scalar_lea.hbm %s368_s1, 512 }
  0x14   :  { %s27_s24 = sshll.u32 %s294_s23, 4  ;;  %p242_p8 = scmp.ne.s32.totalorder %s368_s1, %s241_s27  ;;  %s28_s24 = int_to_ptr.vmem [resolvable:$true] %s27_s24 }
  0x15   :  { %p245_p9 = scmp.lt.u32.totalorder %s241_s27, %s368_s1 }
  0x17   :  { %p247_p10 = pnand %p245_p9, %p242_p8 }
  0x19   :  { %250 = shalt.err (!%p247_p10)
}
  0x1a   :  { %s251_s4 = scalar_lea.vmem %s28_s24, 512  ;;  %p256_p12 = scmp.lt.s32.totalorder %s28_s24, %s28_s24 }
  0x1b   :  { %p252_p11 = scmp.ne.s32.totalorder %s28_s24, %s251_s4  ;;  %p257_p13 = scmp.lt.s32.totalorder %s251_s4, %s251_s4 }
  0x1d   :  { %p258_p0 = por %p257_p13, %p256_p12 }
  0x1f   :  { %p259_p1 = pnand %p258_p0, %p252_p11 }
  0x21   :  { %262 = shalt.err (!%p259_p1)
}
  0x22   :  { %33 = dma.hbm_to_vmem [thread:$0]  %s368_s1, 512, %s28_s24, [#allocation7], %s292_s19, %s292_s19, %s293_s20  }
  0x23   :  { %285 = dma.done.wait [#allocation4], 256  }
  0x24   :  { %286 = vsyncadd [#allocation4], 4294967040 }
  0x25   :  { %287 = dma.done.wait [#allocation7], 512  }
  0x26   :  { %288 = vsyncadd [#allocation7], 4294966784  ;;  %vm44_vm0 = vcmask 261120   ;;  %v295_v0 = vmov 0.0   ;;  %v51_v1 = vld [vmem:[#allocation6] sm:$0xff]  ;;  %v52_v2 = vld [vmem:[#allocation6 + $0x8] sm:$0xff] }
  0x27   :  { %46 = vst.msk [vmem:[#allocation2 + $0x8] sm:$0xff] %vm44_vm0, %v295_v0  ;;  %45 = vst.msk [vmem:[#allocation2] sm:$0xff] %vm44_vm0, %v295_v0  ;;  %v53_v3 = vld [vmem:[#allocation6 + $0x10] sm:$0xff]  ;;  %v201_v4 = vpack.c.bf16 %v52_v2, %v51_v1  ;;  %v54_v5 = vld [vmem:[#allocation6 + $0x18] sm:$0xff]  ;;  %s296_s1 = smov [#allocation8]  }
  0x28   :  { %vm202_vm1 = vmpackc.low %vm44_vm0, %vm44_vm0  ;;  %v49_v6 = vld [vmem:[#allocation3] sm:$0xff]  ;;  %v207_v7 = vpack.c.bf16 %v54_v5, %v53_v3  ;;  %v50_v8 = vld [vmem:[#allocation3 + $0x8] sm:$0xff]  ;;  %s165_s6 = sshll.u32 %s296_s1, 4  ;;  %s166_s6 = int_to_ptr.vmem [resolvable:$true] %s165_s6 }
  0x29   :  { %198 = vmatprep.mubr.msk.f32.mxu0 %vm44_vm0, %v49_v6  ;;  %203 = vmatprep.subr.msk.bf16.mxu0 %vm202_vm1, %v201_v4  ;;  %s263_s7 = scalar_lea.vmem %s166_s6, 256  ;;  %p268_p3 = scmp.lt.s32.totalorder %s166_s6, %s166_s6 }
  0x2a   :  { %206 = vmatpush3.bf16.xpose.msk.msra.mxu0 %vm202_vm1, %v201_v4  ;;  %p264_p2 = scmp.ne.s32.totalorder %s166_s6, %s263_s7  ;;  %p269_p4 = scmp.lt.s32.totalorder %s263_s7, %s263_s7 }
  0x2b   :  { %209 = vmatprep.subr.msk.bf16.mxu0 %vm202_vm1, %v207_v7 }
  0x2c   :  { %p270_p5 = por %p269_p4, %p268_p3 }
  0x2e   :  { %v48_v9 = vld [vmem:[#allocation2 + $0x8] sm:$0xff]  ;;  %v47_v10 = vld [vmem:[#allocation2] sm:$0xff]  ;;  %p271_p6 = pnand %p270_p5, %p264_p2 }
  0x32   :  { %212 = vmatpush3.bf16.xpose.msk.msra.mxu0 %vm202_vm1, %v207_v7 }
  0x39   :  { %199 = vmatmul.mubr.msk.f32.vlgmr.msra.gmra.mrb[0].mxu0 %vm44_vm0, %v50_v8 }
 0x10c   :  { %v200_v11 = vpop.f32.mrb[0].mxu0 }
 0x10d   :  { %v150_v12 = vadd.f32 %v200_v11, %v48_v9  ;;  %v140_v13 = vpop.f32.mrb[1].mxu0 }
 0x10e   :  { %v149_v14 = vadd.f32 %v140_v13, %v47_v10 }
 0x10f   :  { %152 = vst.msk [vmem:[#allocation2 + $0x8] sm:$0xff] %vm44_vm0, %v150_v12 }
 0x110   :  { %151 = vst.msk [vmem:[#allocation2] sm:$0xff] %vm44_vm0, %v149_v14 }
 0x116   :  { %v157_v15 = vld [vmem:[#allocation2 + $0x8] sm:$0xff] }
 0x117   :  { %v156_v16 = vld [vmem:[#allocation2] sm:$0xff]  ;;  %159 = vst.msk [vmem:[#allocation8 + $0x8] sm:$0xff] %vm44_vm0, %v157_v15 }
 0x118   :  { %158 = vst.msk [vmem:[#allocation8] sm:$0xff] %vm44_vm0, %v156_v16 }
 0x119   :  { %274 = shalt.err (!%p271_p6)
}
 0x11a   :  { %s275_s10 = scalar_lea.hbm %s369_s2, 256 }
 0x11b   :  { %p276_p7 = scmp.ne.s32.totalorder %s369_s2, %s275_s10  ;;  %p279_p8 = scmp.lt.u32.totalorder %s275_s10, %s369_s2 }
 0x11d   :  { %p281_p9 = pnand %p279_p8, %p276_p7 }
 0x11f   :  { %284 = shalt.err (!%p281_p9)
}
 0x120   :  { %171 = dma.vmem_to_hbm [thread:$0]  %s166_s6, 256, %s369_s2, [#allocation5], %s292_s19, %s292_s19, %s293_s20  }
 0x121   :  { %289 = dma.done.wait [#allocation5], 256  }
 0x122   :  { %290 = vsyncadd [#allocation5], 4294967040 }
 0x123   :  { %175 = vsyncpa [#allocation4], 1 }
 0x124   :  { %176 = vsyncpa [#allocation7], 1 }
 0x125   :  { %177 = vsyncpa [#allocation5], 1 }

</bundles_post_ra>
